<compile_context>
chip_gen: v7x
topology: tpu7x:2x2x1
jax: 0.10.0
libtpu: 0.0.40
codegen_flags: <defaults>
</compile_context>

<pallas_src>
import jax
import jax.numpy as jnp
from jax.experimental import pallas as pl
from jax.experimental.pallas import tpu as pltpu

_LANE = 1024          # lane-dense last dim: multiple of 128 -> unmasked vst
_MAX_BLOCK_ROWS = 512 # 512 x 1024 f32 = 2 MiB per output block


def _broadcast_w_kernel(w_ref, out_ref):
    # w_ref: (1,) scalar in SMEM; out_ref: (block_rows, LANE) VMEM tile.
    # Bare store of the broadcast value -- no zeros slab, no VPU add.
    out_ref[...] = jnp.full(out_ref.shape, w_ref[0], out_ref.dtype)


def dummy_model_forward(coords, params, sdf, w):
    """Replicates DummyModel.forward: returns zeros(batch, n, 1) + w."""
    batch, n, _ = coords.shape
    # params / sdf are accepted (as in the PyTorch signature) but unused.
    del params, sdf

    out_dtype = w.dtype
    total = batch * n

    # Lane-dense padded layout: (rows_padded, _LANE), last dim multiple of 128.
    rows = pl.cdiv(total, _LANE)
    block_rows = min(_MAX_BLOCK_ROWS, rows)
    rows_padded = pl.cdiv(rows, block_rows) * block_rows
    grid = (rows_padded // block_rows,)

    out_padded = pl.pallas_call(
        _broadcast_w_kernel,
        out_shape=jax.ShapeDtypeStruct((rows_padded, _LANE), out_dtype),
        grid=grid,
        in_specs=[pl.BlockSpec(memory_space=pltpu.MemorySpace.SMEM)],
        out_specs=pl.BlockSpec((block_rows, _LANE), lambda i: (i, 0)),
        compiler_params=pltpu.CompilerParams(
            dimension_semantics=("parallel",),
        ),
    )(w)

    # Strip padding and present the PyTorch output shape (batch, n, 1).
    return out_padded.reshape(-1)[:total].reshape(batch, n, 1)


if __name__ == "__main__":
    key = jax.random.PRNGKey(0)
    k_coords, k_params, k_sdf = jax.random.split(key, 3)

    batch, n = 2, 8
    coords = jax.random.normal(k_coords, (batch, n, 3), dtype=jnp.float32)
    params = jax.random.normal(k_params, (batch, 32), dtype=jnp.float32)
    sdf = jax.random.normal(k_sdf, (batch, n, 1), dtype=jnp.float32)

    # Deterministic parameter init matching torch.nn.Parameter(torch.zeros(1)).
    w = jnp.zeros((1,), dtype=jnp.float32)

    out = dummy_model_forward(coords, params, sdf, w)
    jax.block_until_ready(out)

    assert out.shape == (batch, n, 1), out.shape
    assert out.dtype == jnp.float32
    # With w == 0 the output must be exactly zeros(batch, n, 1).
    assert bool(jnp.all(out == 0.0))

    # Sanity check broadcasting semantics with a nonzero w as well.
    out2 = dummy_model_forward(coords, params, sdf, jnp.full((1,), 1.5, jnp.float32))
    jax.block_until_ready(out2)
    assert out2.shape == (batch, n, 1)
    assert bool(jnp.all(out2 == 1.5))

    print("KERNEL_OK")
</pallas_src>

<mosaic_0001>
module attributes {stable_mosaic.version = 11 : i64} {
  func.func @_broadcast_w_kernel(%arg0: i32, %arg1: memref<1xf32, #tpu.memory_space<smem>>, %arg2: memref<1x1024xf32, #tpu.memory_space<vmem>>) attributes {dimension_semantics = [#tpu.dimension_semantics<parallel>], iteration_bounds = array<i64: 1>, scalar_prefetch = 0 : i64, scratch_operands = 0 : i64, tpu.core_type = #tpu.core_type<tc>, window_params = [{transform_indices = @transform_0, window_bounds = array<i64: 1>}, {transform_indices = @transform_1, window_bounds = array<i64: 1, 1024>}]} {
    %c0 = arith.constant 0 : index
    %0 = memref.load %arg1[%c0] : memref<1xf32, #tpu.memory_space<smem>>
    %1 = vector.broadcast %0 : f32 to vector<1x1024xf32>
    %c0_0 = arith.constant 0 : index
    %c0_1 = arith.constant 0 : index
    %2 = vector.load %arg2[%c0_0, %c0_1] : memref<1x1024xf32, #tpu.memory_space<vmem>>, vector<1x1024xf32>
    tpu.vector_store %arg2[%c0_0, %c0_1], %1 {strides = array<i32>} : memref<1x1024xf32, #tpu.memory_space<vmem>>, vector<1x1024xf32>,
    return
  }
  func.func @transform_0(%arg0: i32) -> i32 {
    %c0_i32 = arith.constant 0 : i32
    %c0_i32_0 = arith.constant 0 : i32
    return %c0_i32 : i32
  }
  func.func @transform_1(%arg0: i32) -> (i32, i32) {
    %c0_i32 = arith.constant 0 : i32
    %c0_i32_0 = arith.constant 0 : i32
    return %arg0, %c0_i32 : i32, i32
  }
}

</mosaic_0001>

<bundles_post_ra>
// kernel: tpu_custom_call.1
= control target key start
LH: loop header
LB: loop body
LE: loop exit
PB: predicated region body
PF: predicated region fallthrough
CT: control target
= control target key end

     0   :  { %s78_s0 = inlined_call_operand.<no memory space> [shape: f32[1], index: 0, kind: input, shape index: {}]   ;;  %s79_s1 = inlined_call_operand.hbm [shape: f32[1,1024], index: 1, kind: output, shape index: {}]  }
   0x1   :  { %v11_v0 = vstv %s78_s0 }
   0x2   :  { %7 = vsyncpa [#allocation4], 0  ;;  %12 = vst [vmem:[#allocation3] sm:$0xff] %v11_v0  ;;  %s52_s8 = smov [#allocation3]  }
   0x3   :  { %s19_s9 = sshll.u32 %s52_s8, 4  ;;  %s20_s9 = int_to_ptr.vmem [resolvable:$true] %s19_s9 }
   0x4   :  { %s28_s10 = scalar_lea.vmem %s20_s9, 128  ;;  %p33_p1 = scmp.lt.s32.totalorder %s20_s9, %s20_s9 }
   0x5   :  { %p29_p0 = scmp.ne.s32.totalorder %s20_s9, %s28_s10  ;;  %p34_p2 = scmp.lt.s32.totalorder %s28_s10, %s28_s10 }
   0x7   :  { %p35_p3 = por %p34_p2, %p33_p1 }
   0x9   :  { %p36_p4 = pnand %p35_p3, %p29_p0 }
   0xb   :  { %39 = shalt.err (!%p36_p4)
}
   0xc   :  { %s40_s13 = scalar_lea.hbm %s79_s1, 128 }
   0xd   :  { %p41_p5 = scmp.ne.s32.totalorder %s79_s1, %s40_s13  ;;  %p44_p6 = scmp.lt.u32.totalorder %s40_s13, %s79_s1 }
   0xf   :  { %p46_p7 = pnand %p44_p6, %p41_p5 }
  0x11   :  { %49 = shalt.err (!%p46_p7)
}
  0x12   :  { %22 = dma.vmem_to_hbm [thread:$0]  %s20_s9, 128, %s79_s1, [#allocation4]  }
  0x13   :  { %50 = dma.done.wait [#allocation4], 128  }
  0x14   :  { %51 = vsyncadd [#allocation4], 4294967168 }
  0x15   :  { %26 = vsyncpa [#allocation4], 1 }

</bundles_post_ra>
